<compile_context>
chip_gen: v6e
topology: v6e:2x2x1
jax: 0.10.0
libtpu: 0.0.40
codegen_flags: <defaults>
</compile_context>

<pallas_src>
import functools

import jax
import jax.numpy as jnp
from jax.experimental import pallas as pl
from jax.experimental.pallas import tpu as pltpu


D_INPUT = 350
HIDDEN = (275, 200, 125, 50)
LEAKY_SLOPE = 0.01          # F.leaky_relu default negative_slope


def _round_up(n, m):
    return (n + m - 1) // m * m


def _cdiv(a, b):
    return -(-a // b)


def _device_kind():
    try:
        return jax.devices()[0].device_kind.lower()
    except Exception:
        return ""


def _bf16_activations():
    # bf16-native VALUs only on v6e / v7x; v5e (and older) would insert extra converts.
    kind = _device_kind()
    return ("v6" in kind) or ("v7" in kind) or ("7x" in kind)


def _default_tile_rows():
    kind = _device_kind()
    if ("v7" in kind) or ("7x" in kind):
        return 2048   # 64 MiB VMEM per TensorCore: keep DB x-tiles + f32 temps well under ~48 MB
    return 4096       # v5e / v6e: 128 MiB VMEM


def classifier2_kernel(x_ref,
                       w0_ref, b0_ref,
                       w1_ref, b1_ref,
                       w2_ref, b2_ref,
                       w3_ref, b3_ref,
                       w4_ref, b4_ref,
                       o_ref, *, act_dtype):
    def layer(h_bf16, w_ref, b_ref):
        # bf16 operands into the MXU, f32 accumulation.
        z = jnp.dot(h_bf16, w_ref[...], preferred_element_type=jnp.float32)
        # bias-add + leaky_relu in act_dtype (bf16 on v6e/v7x, f32 on v5e).
        z = z.astype(act_dtype) + b_ref[...].astype(act_dtype)
        z = jnp.maximum(z, LEAKY_SLOPE * z)         # leaky_relu (one vmul + vmax)
        return z.astype(jnp.bfloat16)

    # Fused f32 -> bf16 cast of the input tile; cheap VPU work hidden under the matmuls.
    h = x_ref[...].astype(jnp.bfloat16)
    h = layer(h, w0_ref, b0_ref)
    h = layer(h, w1_ref, b1_ref)
    h = layer(h, w2_ref, b2_ref)
    h = layer(h, w3_ref, b3_ref)

    # Output layer (50 -> 1): broadcast multiply + lane reduction, f32 accumulate.
    logits = jnp.sum(h.astype(jnp.float32) * w4_ref[...], axis=-1, keepdims=True)
    # Store raw logits; sigmoid is applied (stably) in the wrapper on the (B, 1) slice.
    o_ref[...] = logits + b4_ref[...]


@functools.partial(jax.jit, static_argnames=("tb",))
def classifier2_forward(x, params, tb=None):
    """x: (B, 350) float32. params: list of (W, b) with W shaped (in, out), b shaped (1, out)."""
    B = x.shape[0]
    tb = _default_tile_rows() if tb is None else int(tb)

    TB = min(tb, _round_up(B, 16))
    if B >= 2048:
        # Large batch: keep >= 4 pipeline steps so v7x's two TensorCores both get work.
        TB = min(TB, _round_up(_cdiv(B, 4), 16))
    TB = max(16, _round_up(TB, 16))
    B_pad = _round_up(B, TB)

    # Only zero-pad to the tile boundary; x stays f32 (bf16 cast happens in-kernel).
    x_pad = jnp.pad(x, ((0, B_pad - B), (0, 0)))

    ws, bs = zip(*params)
    operands = [x_pad]
    for j in range(4):
        operands.append(ws[j].astype(jnp.bfloat16))     # hidden-layer weights as bf16
        operands.append(bs[j].astype(jnp.float32))       # biases f32 (cast in-kernel if needed)
    operands.append(ws[4].T.astype(jnp.float32))         # (1, 50) output weight row
    operands.append(bs[4].astype(jnp.float32))            # (1, 1)  output bias

    in_specs = [pl.BlockSpec((TB, D_INPUT), lambda i: (i, 0))]          # batch-tiled x
    for op in operands[1:]:
        in_specs.append(pl.BlockSpec(op.shape, lambda i: (0, 0)))       # weights stay resident
    out_spec = pl.BlockSpec((TB, 1), lambda i: (i, 0))                  # narrow logit column

    act_dtype = jnp.bfloat16 if _bf16_activations() else jnp.float32

    logits = pl.pallas_call(
        functools.partial(classifier2_kernel, act_dtype=act_dtype),
        out_shape=jax.ShapeDtypeStruct((B_pad, 1), jnp.float32),
        grid=(B_pad // TB,),
        in_specs=in_specs,
        out_specs=out_spec,
        compiler_params=pltpu.CompilerParams(
            dimension_semantics=("parallel",),           # megacore sharding on v7x
            vmem_limit_bytes=48 * 1024 * 1024,           # fits under v7x's 64 MiB/TC
        ),
    )(*operands)

    # Numerically stable sigmoid on the real rows only (trivial XLA op on (B, 1)).
    return jax.nn.sigmoid(logits[:B])


def init_params(key):
    """Deterministic init matching PyTorch nn.Linear default: U(-1/sqrt(fan_in), 1/sqrt(fan_in)).

    Weights stored as (in, out) = transpose of PyTorch's (out, in), so forward is x @ W + b.
    """
    dims = [D_INPUT, *HIDDEN, 1]
    params = []
    for i in range(len(dims) - 1):
        fan_in, fan_out = dims[i], dims[i + 1]
        key, kw, kb = jax.random.split(key, 3)
        bound = 1.0 / jnp.sqrt(jnp.float32(fan_in))
        w = jax.random.uniform(kw, (fan_in, fan_out), jnp.float32, -bound, bound)
        b = jax.random.uniform(kb, (1, fan_out), jnp.float32, -bound, bound)
        params.append((w, b))
    return params


def reference_forward(x, params, act_dtype):
    """Pure-JAX reference replicating the kernel's dtype path (bf16 matmul, f32 accumulate)."""
    h = x.astype(jnp.bfloat16)
    for w, b in params[:-1]:
        z = jnp.dot(h, w.astype(jnp.bfloat16), preferred_element_type=jnp.float32)
        z = z.astype(act_dtype) + b.astype(act_dtype)
        z = jnp.maximum(z, LEAKY_SLOPE * z)
        h = z.astype(jnp.bfloat16)
    w, b = params[-1]
    logits = jnp.sum(h.astype(jnp.float32) * w.T, axis=-1, keepdims=True) + b
    return jax.nn.sigmoid(logits)


if __name__ == "__main__":
    key = jax.random.PRNGKey(0)
    key, kx = jax.random.split(key)

    batch = 8  # small test batch; real deployments should batch thousands of rows
    x = jax.random.normal(kx, (batch, D_INPUT), jnp.float32)
    params = init_params(key)

    out = jax.block_until_ready(classifier2_forward(x, params))
    assert out.shape == (batch, 1), out.shape
    assert bool(jnp.all(jnp.isfinite(out)))

    act_dtype = jnp.bfloat16 if _bf16_activations() else jnp.float32
    ref = reference_forward(x, params, act_dtype)
    max_err = float(jnp.max(jnp.abs(out - ref)))
    assert max_err < 2e-3, f"max abs err {max_err}"

    print("KERNEL_OK")
</pallas_src>

<mosaic_0001>
module attributes {stable_mosaic.version = 11 : i64} {
  func.func @classifier2_kernel(%arg0: i32, %arg1: memref<16x350xf32, #tpu.memory_space<vmem>>, %arg2: memref<350x275xbf16, #tpu.memory_space<vmem>>, %arg3: memref<1x275xf32, #tpu.memory_space<vmem>>, %arg4: memref<275x200xbf16, #tpu.memory_space<vmem>>, %arg5: memref<1x200xf32, #tpu.memory_space<vmem>>, %arg6: memref<200x125xbf16, #tpu.memory_space<vmem>>, %arg7: memref<1x125xf32, #tpu.memory_space<vmem>>, %arg8: memref<125x50xbf16, #tpu.memory_space<vmem>>, %arg9: memref<1x50xf32, #tpu.memory_space<vmem>>, %arg10: memref<1x50xf32, #tpu.memory_space<vmem>>, %arg11: memref<1x1xf32, #tpu.memory_space<vmem>>, %arg12: memref<16x1xf32, #tpu.memory_space<vmem>>) attributes {dimension_semantics = [#tpu.dimension_semantics<parallel>], iteration_bounds = array<i64: 1>, scalar_prefetch = 0 : i64, scratch_operands = 0 : i64, tpu.core_type = #tpu.core_type<tc>, window_params = [{transform_indices = @transform_0, window_bounds = array<i64: 16, 350>}, {pipeline_mode = #tpu.pipeline_mode<synchronous>, transform_indices = @transform_1, window_bounds = array<i64: 350, 275>}, {pipeline_mode = #tpu.pipeline_mode<synchronous>, transform_indices = @transform_2, window_bounds = array<i64: 1, 275>}, {pipeline_mode = #tpu.pipeline_mode<synchronous>, transform_indices = @transform_3, window_bounds = array<i64: 275, 200>}, {pipeline_mode = #tpu.pipeline_mode<synchronous>, transform_indices = @transform_4, window_bounds = array<i64: 1, 200>}, {pipeline_mode = #tpu.pipeline_mode<synchronous>, transform_indices = @transform_5, window_bounds = array<i64: 200, 125>}, {pipeline_mode = #tpu.pipeline_mode<synchronous>, transform_indices = @transform_6, window_bounds = array<i64: 1, 125>}, {pipeline_mode = #tpu.pipeline_mode<synchronous>, transform_indices = @transform_7, window_bounds = array<i64: 125, 50>}, {pipeline_mode = #tpu.pipeline_mode<synchronous>, transform_indices = @transform_8, window_bounds = array<i64: 1, 50>}, {pipeline_mode = #tpu.pipeline_mode<synchronous>, transform_indices = @transform_9, window_bounds = array<i64: 1, 50>}, {pipeline_mode = #tpu.pipeline_mode<synchronous>, transform_indices = @transform_10, window_bounds = array<i64: 1, 1>}, {transform_indices = @transform_11, window_bounds = array<i64: 16, 1>}]} {
    %c0 = arith.constant 0 : index
    %c0_0 = arith.constant 0 : index
    %0 = vector.load %arg1[%c0, %c0_0] : memref<16x350xf32, #tpu.memory_space<vmem>>, vector<16x350xf32>
    %1 = arith.truncf %0 : vector<16x350xf32> to vector<16x350xbf16>
    %c0_1 = arith.constant 0 : index
    %c0_2 = arith.constant 0 : index
    %2 = vector.load %arg2[%c0_1, %c0_2] : memref<350x275xbf16, #tpu.memory_space<vmem>>, vector<350x275xbf16>
    %cst = arith.constant dense<0.000000e+00> : vector<16x275xf32>
    %3 = tpu.matmul %1, %2, %cst {dimension_numbers = #tpu.dot_dimension_numbers<[1], [0], [0], [1], [0, 0, 1, 1], [], []>} : vector<16x350xbf16>, vector<350x275xbf16>, vector<16x275xf32> -> vector<16x275xf32>
    %c0_3 = arith.constant 0 : index
    %c0_4 = arith.constant 0 : index
    %4 = vector.load %arg3[%c0_3, %c0_4] : memref<1x275xf32, #tpu.memory_space<vmem>>, vector<1x275xf32>
    %5 = vector.broadcast %4 : vector<1x275xf32> to vector<16x275xf32>
    %6 = arith.addf %3, %5 : vector<16x275xf32>
    %cst_5 = arith.constant 0.00999999977 : f32
    %7 = vector.broadcast %cst_5 : f32 to vector<16x275xf32>
    %8 = arith.mulf %7, %6 : vector<16x275xf32>
    %9 = arith.maximumf %6, %8 : vector<16x275xf32>
    %10 = arith.truncf %9 : vector<16x275xf32> to vector<16x275xbf16>
    %c0_6 = arith.constant 0 : index
    %c0_7 = arith.constant 0 : index
    %11 = vector.load %arg4[%c0_6, %c0_7] : memref<275x200xbf16, #tpu.memory_space<vmem>>, vector<275x200xbf16>
    %cst_8 = arith.constant dense<0.000000e+00> : vector<16x200xf32>
    %12 = tpu.matmul %10, %11, %cst_8 {dimension_numbers = #tpu.dot_dimension_numbers<[1], [0], [0], [1], [0, 0, 1, 1], [], []>} : vector<16x275xbf16>, vector<275x200xbf16>, vector<16x200xf32> -> vector<16x200xf32>
    %c0_9 = arith.constant 0 : index
    %c0_10 = arith.constant 0 : index
    %13 = vector.load %arg5[%c0_9, %c0_10] : memref<1x200xf32, #tpu.memory_space<vmem>>, vector<1x200xf32>
    %14 = vector.broadcast %13 : vector<1x200xf32> to vector<16x200xf32>
    %15 = arith.addf %12, %14 : vector<16x200xf32>
    %cst_11 = arith.constant 0.00999999977 : f32
    %16 = vector.broadcast %cst_11 : f32 to vector<16x200xf32>
    %17 = arith.mulf %16, %15 : vector<16x200xf32>
    %18 = arith.maximumf %15, %17 : vector<16x200xf32>
    %19 = arith.truncf %18 : vector<16x200xf32> to vector<16x200xbf16>
    %c0_12 = arith.constant 0 : index
    %c0_13 = arith.constant 0 : index
    %20 = vector.load %arg6[%c0_12, %c0_13] : memref<200x125xbf16, #tpu.memory_space<vmem>>, vector<200x125xbf16>
    %cst_14 = arith.constant dense<0.000000e+00> : vector<16x125xf32>
    %21 = tpu.matmul %19, %20, %cst_14 {dimension_numbers = #tpu.dot_dimension_numbers<[1], [0], [0], [1], [0, 0, 1, 1], [], []>} : vector<16x200xbf16>, vector<200x125xbf16>, vector<16x125xf32> -> vector<16x125xf32>
    %c0_15 = arith.constant 0 : index
    %c0_16 = arith.constant 0 : index
    %22 = vector.load %arg7[%c0_15, %c0_16] : memref<1x125xf32, #tpu.memory_space<vmem>>, vector<1x125xf32>
    %23 = vector.broadcast %22 : vector<1x125xf32> to vector<16x125xf32>
    %24 = arith.addf %21, %23 : vector<16x125xf32>
    %cst_17 = arith.constant 0.00999999977 : f32
    %25 = vector.broadcast %cst_17 : f32 to vector<16x125xf32>
    %26 = arith.mulf %25, %24 : vector<16x125xf32>
    %27 = arith.maximumf %24, %26 : vector<16x125xf32>
    %28 = arith.truncf %27 : vector<16x125xf32> to vector<16x125xbf16>
    %c0_18 = arith.constant 0 : index
    %c0_19 = arith.constant 0 : index
    %29 = vector.load %arg8[%c0_18, %c0_19] : memref<125x50xbf16, #tpu.memory_space<vmem>>, vector<125x50xbf16>
    %cst_20 = arith.constant dense<0.000000e+00> : vector<16x50xf32>
    %30 = tpu.matmul %28, %29, %cst_20 {dimension_numbers = #tpu.dot_dimension_numbers<[1], [0], [0], [1], [0, 0, 1, 1], [], []>} : vector<16x125xbf16>, vector<125x50xbf16>, vector<16x50xf32> -> vector<16x50xf32>
    %c0_21 = arith.constant 0 : index
    %c0_22 = arith.constant 0 : index
    %31 = vector.load %arg9[%c0_21, %c0_22] : memref<1x50xf32, #tpu.memory_space<vmem>>, vector<1x50xf32>
    %32 = vector.broadcast %31 : vector<1x50xf32> to vector<16x50xf32>
    %33 = arith.addf %30, %32 : vector<16x50xf32>
    %cst_23 = arith.constant 0.00999999977 : f32
    %34 = vector.broadcast %cst_23 : f32 to vector<16x50xf32>
    %35 = arith.mulf %34, %33 : vector<16x50xf32>
    %36 = arith.maximumf %33, %35 : vector<16x50xf32>
    %37 = arith.truncf %36 : vector<16x50xf32> to vector<16x50xbf16>
    %38 = arith.extf %37 : vector<16x50xbf16> to vector<16x50xf32>
    %c0_24 = arith.constant 0 : index
    %c0_25 = arith.constant 0 : index
    %39 = vector.load %arg10[%c0_24, %c0_25] : memref<1x50xf32, #tpu.memory_space<vmem>>, vector<1x50xf32>
    %40 = vector.broadcast %39 : vector<1x50xf32> to vector<16x50xf32>
    %41 = arith.mulf %38, %40 : vector<16x50xf32>
    %cst_26 = arith.constant dense<0.000000e+00> : vector<16xf32>
    %42 = vector.multi_reduction <add>, %41, %cst_26 [1] : vector<16x50xf32> to vector<16xf32>
    %43 = vector.shape_cast %42 : vector<16xf32> to vector<16x1xf32>
    %c0_27 = arith.constant 0 : index
    %c0_28 = arith.constant 0 : index
    %44 = vector.load %arg11[%c0_27, %c0_28] : memref<1x1xf32, #tpu.memory_space<vmem>>, vector<1x1xf32>
    %45 = vector.broadcast %44 : vector<1x1xf32> to vector<16x1xf32>
    %46 = arith.addf %43, %45 : vector<16x1xf32>
    %c0_29 = arith.constant 0 : index
    %c0_30 = arith.constant 0 : index
    %47 = vector.load %arg12[%c0_29, %c0_30] : memref<16x1xf32, #tpu.memory_space<vmem>>, vector<16x1xf32>
    tpu.vector_store %arg12[%c0_29, %c0_30], %46 {strides = array<i32>} : memref<16x1xf32, #tpu.memory_space<vmem>>, vector<16x1xf32>,
    return
  }
  func.func @transform_0(%arg0: i32) -> (i32, i32) {
    %c0_i32 = arith.constant 0 : i32
    %c0_i32_0 = arith.constant 0 : i32
    return %arg0, %c0_i32 : i32, i32
  }
  func.func @transform_1(%arg0: i32) -> (i32, i32) {
    %c0_i32 = arith.constant 0 : i32
    %c0_i32_0 = arith.constant 0 : i32
    %c0_i32_1 = arith.constant 0 : i32
    return %c0_i32, %c0_i32_0 : i32, i32
  }
  func.func @transform_2(%arg0: i32) -> (i32, i32) {
    %c0_i32 = arith.constant 0 : i32
    %c0_i32_0 = arith.constant 0 : i32
    %c0_i32_1 = arith.constant 0 : i32
    return %c0_i32, %c0_i32_0 : i32, i32
  }
  func.func @transform_3(%arg0: i32) -> (i32, i32) {
    %c0_i32 = arith.constant 0 : i32
    %c0_i32_0 = arith.constant 0 : i32
    %c0_i32_1 = arith.constant 0 : i32
    return %c0_i32, %c0_i32_0 : i32, i32
  }
  func.func @transform_4(%arg0: i32) -> (i32, i32) {
    %c0_i32 = arith.constant 0 : i32
    %c0_i32_0 = arith.constant 0 : i32
    %c0_i32_1 = arith.constant 0 : i32
    return %c0_i32, %c0_i32_0 : i32, i32
  }
  func.func @transform_5(%arg0: i32) -> (i32, i32) {
    %c0_i32 = arith.constant 0 : i32
    %c0_i32_0 = arith.constant 0 : i32
    %c0_i32_1 = arith.constant 0 : i32
    return %c0_i32, %c0_i32_0 : i32, i32
  }
  func.func @transform_6(%arg0: i32) -> (i32, i32) {
    %c0_i32 = arith.constant 0 : i32
    %c0_i32_0 = arith.constant 0 : i32
    %c0_i32_1 = arith.constant 0 : i32
    return %c0_i32, %c0_i32_0 : i32, i32
  }
  func.func @transform_7(%arg0: i32) -> (i32, i32) {
    %c0_i32 = arith.constant 0 : i32
    %c0_i32_0 = arith.constant 0 : i32
    %c0_i32_1 = arith.constant 0 : i32
    return %c0_i32, %c0_i32_0 : i32, i32
  }
  func.func @transform_8(%arg0: i32) -> (i32, i32) {
    %c0_i32 = arith.constant 0 : i32
    %c0_i32_0 = arith.constant 0 : i32
    %c0_i32_1 = arith.constant 0 : i32
    return %c0_i32, %c0_i32_0 : i32, i32
  }
  func.func @transform_9(%arg0: i32) -> (i32, i32) {
    %c0_i32 = arith.constant 0 : i32
    %c0_i32_0 = arith.constant 0 : i32
    %c0_i32_1 = arith.constant 0 : i32
    return %c0_i32, %c0_i32_0 : i32, i32
  }
  func.func @transform_10(%arg0: i32) -> (i32, i32) {
    %c0_i32 = arith.constant 0 : i32
    %c0_i32_0 = arith.constant 0 : i32
    %c0_i32_1 = arith.constant 0 : i32
    return %c0_i32, %c0_i32_0 : i32, i32
  }
  func.func @transform_11(%arg0: i32) -> (i32, i32) {
    %c0_i32 = arith.constant 0 : i32
    %c0_i32_0 = arith.constant 0 : i32
    return %arg0, %c0_i32 : i32, i32
  }
}

</mosaic_0001>

<bundles_post_ra>
// kernel: classifier2_forward.1
= control target key start
LH: loop header
LB: loop body
LE: loop exit
PB: predicated region body
PF: predicated region fallthrough
CT: control target
= control target key end

     0   :  { %vm508_vm0 = vcmask 1046528   ;;  %v1727_v1 = vmov 0   ;;  %vm504_vm1 = vcmask 769024   ;;  %vm1729_vm2 = vmmov 0   ;;  %s2257_s1 = inlined_call_operand.vmem [shape: bf16[350,275], index: 1, kind: input, shape index: {}]   ;;  %s2258_s0 = inlined_call_operand.vmem [shape: f32[16,350], index: 0, kind: input, shape index: {}]   ;;  %s2259_s3 = inlined_call_operand.vmem [shape: bf16[275,200], index: 3, kind: input, shape index: {}]   ;;  %s2260_s5 = inlined_call_operand.vmem [shape: bf16[200,125], index: 5, kind: input, shape index: {}]   ;;  %s2261_s2 = inlined_call_operand.vmem [shape: f32[1,275], index: 2, kind: input, shape index: {}]   ;;  %s2262_s7 = inlined_call_operand.vmem [shape: bf16[125,50], index: 7, kind: input, shape index: {}]   ;;  %s2263_s4 = inlined_call_operand.vmem [shape: f32[1,200], index: 4, kind: input, shape index: {}]   ;;  %s2264_s6 = inlined_call_operand.vmem [shape: f32[1,125], index: 6, kind: input, shape index: {}]   ;;  %s2265_s10 = inlined_call_operand.<no memory space> [shape: f32[1,1], index: 10, kind: input, shape index: {}]   ;;  %s2266_s8 = inlined_call_operand.vmem [shape: f32[1,50], index: 8, kind: input, shape index: {}]   ;;  %s2267_s9 = inlined_call_operand.vmem [shape: f32[1,50], index: 9, kind: input, shape index: {}]   ;;  %s2268_s11 = inlined_call_operand.vmem [shape: f32[16,1], index: 11, kind: output, shape index: {}]  }
   0x1   :  { %v1565_v0 = vld [vmem:[%s2257_s1 + $0xac] ss:$12 sps:$4 sm:$0xff]   ;;  %593 = vmatprep.mubr.bf16.mxu1 %v1727_v1  ;;  %v1567_v2 = vld [vmem:[%s2257_s1 + $0x1fc] ss:$12 sps:$4 sm:$0x7f]   ;;  %v43_v27 = vld [vmem:[%s2258_s0 + $0x10] sm:$0xff] }
   0x2   :  { %518 = vmatprep.subr.bf16.mxu0 %v1565_v0  ;;  %v1569_v3 = vld [vmem:[%s2257_s1 + $0xa8] ss:$12 sps:$4 sm:$0xff]   ;;  %v1570_v4 = vld [vmem:[%s2257_s1 + $0x1f8] ss:$12 sps:$4 sm:$0x7f]   ;;  %1420 = vmatprep.subr.msk.bf16.mxu1 %vm508_vm0, %v1567_v2  ;;  %vm927_vm3 = vcmask 1040384  }
   0x3   :  { %v1571_v5 = vld [vmem:[%s2257_s1 + $0x94] ss:$12 sps:$4 sm:$0xff]   ;;  %519 = vmatpush1.bf16.msra.mxu0 %v1569_v3  ;;  %v510_v6 = vsel %vm508_vm0, %v1570_v4, 0  ;;  %v1573_v7 = vld [vmem:[%s2257_s1 + $0x1e4] ss:$12 sps:$4 sm:$0xff]   ;;  %v46_v28 = vld [vmem:[%s2258_s0 + $0x28] sm:$0xff] }
   0x4   :  { %v1575_v8 = vld [vmem:[%s2257_s1 + $0x90] ss:$12 sps:$4 sm:$0xff]   ;;  %566 = vmatpush1.bf16.msra.mxu1 %v510_v6  ;;  %520 = vmatprep.subr.bf16.mxu0 %v1571_v5  ;;  %v1576_v9 = vld [vmem:[%s2257_s1 + $0x1e0] ss:$12 sps:$4 sm:$0xff]   ;;  %v1581_v12 = vld [vmem:[%s2257_s1 + $0x78] ss:$12 sps:$4 sm:$0xff]   ;;  %v1878_v30 = vpack.c.bf16 %v46_v28, %v43_v27 }
   0x5   :  { %567 = vmatprep.subr.bf16.mxu1 %v1573_v7  ;;  %v1577_v10 = vld [vmem:[%s2257_s1 + $0x7c] ss:$12 sps:$4 sm:$0xff]   ;;  %v1579_v11 = vld [vmem:[%s2257_s1 + $0x1cc] ss:$12 sps:$4 sm:$0xff]   ;;  %v1583_v14 = vld [vmem:[%s2257_s1 + $0x64] ss:$12 sps:$4 sm:$0xff]  }
   0x6   :  { %v1582_v13 = vld [vmem:[%s2257_s1 + $0x1c8] ss:$12 sps:$4 sm:$0xff]   ;;  %v1587_v16 = vld [vmem:[%s2257_s1 + $0x60] ss:$12 sps:$4 sm:$0xff]   ;;  %v1588_v17 = vld [vmem:[%s2257_s1 + $0x1b0] ss:$12 sps:$4 sm:$0xff]  }
   0x7   :  { %521 = vmatpush1.bf16.msra.mxu0 %v1575_v8  ;;  %v1585_v15 = vld [vmem:[%s2257_s1 + $0x1b4] ss:$12 sps:$4 sm:$0xff]   ;;  %v1589_v18 = vld [vmem:[%s2257_s1 + $0x4c] ss:$12 sps:$4 sm:$0xff]   ;;  %v1591_v19 = vld [vmem:[%s2257_s1 + $0x19c] ss:$12 sps:$4 sm:$0xff]  }
   0x8   :  { %568 = vmatpush1.bf16.msra.mxu1 %v1576_v9  ;;  %522 = vmatprep.subr.bf16.mxu0 %v1577_v10  ;;  %v1593_v20 = vld [vmem:[%s2257_s1 + $0x48] ss:$12 sps:$4 sm:$0xff]   ;;  %v1594_v21 = vld [vmem:[%s2257_s1 + $0x198] ss:$12 sps:$4 sm:$0xff]   ;;  %v1599_v24 = vld [vmem:[%s2257_s1 + $0x30] ss:$12 sps:$4 sm:$0xff]  }
   0x9   :  { %569 = vmatprep.subr.bf16.mxu1 %v1579_v11  ;;  %v1595_v22 = vld [vmem:[%s2257_s1 + $0x34] ss:$12 sps:$4 sm:$0xff]   ;;  %v1597_v23 = vld [vmem:[%s2257_s1 + $0x184] ss:$12 sps:$4 sm:$0xff]   ;;  %v1601_v26 = vld [vmem:[%s2257_s1 + $0x1c] ss:$12 sps:$4 sm:$0xff]  }
   0xa   :  { %v1600_v25 = vld [vmem:[%s2257_s1 + $0x180] ss:$12 sps:$4 sm:$0xff]   ;;  %v1603_v29 = vld [vmem:[%s2257_s1 + $0x170] ss:$12 sps:$4 sm:$0xff]   ;;  %v1604_v31 = vld [vmem:[%s2257_s1 + $0x18] ss:$12 sps:$4 sm:$0xff]  }
   0xb   :  { %523 = vmatpush1.bf16.msra.mxu0 %v1581_v12  ;;  %v1605_v32 = vld [vmem:[%s2257_s1 + $0xb0] ss:$12 sps:$4 sm:$0xff]   ;;  %v1608_v34 = vld [vmem:[%s2257_s1 + $0x158] ss:$12 sps:$4 sm:$0xff]   ;;  %v1609_v35 = vld [vmem:[%s2257_s1] ss:$12 sps:$4 sm:$0xff]  }
   0xc   :  { %570 = vmatpush1.bf16.msra.mxu1 %v1582_v13  ;;  %524 = vmatprep.subr.bf16.mxu0 %v1583_v14  ;;  %v1606_v33 = vld [vmem:[%s2257_s1 + $0x4] ss:$12 sps:$4 sm:$0xff]   ;;  %v1611_v37 = vld [vmem:[%s2257_s1 + $0x16c] ss:$12 sps:$4 sm:$0xff]   ;;  %v1614_v39 = vld [vmem:[%s2257_s1 + $0x168] ss:$12 sps:$4 sm:$0xff]  }
   0xd   :  { %571 = vmatprep.subr.bf16.mxu1 %v1585_v15  ;;  %v1610_v36 = vld [vmem:[%s2257_s1 + $0x98] ss:$12 sps:$4 sm:$0xff]   ;;  %v1613_v38 = vld [vmem:[%s2257_s1 + $0x140] ss:$12 sps:$4 sm:$0xff]   ;;  %v1618_v42 = vld [vmem:[%s2257_s1 + $0x128] ss:$12 sps:$4 sm:$0xff]  }
   0xe   :  { %v1615_v40 = vld [vmem:[%s2257_s1 + $0x80] ss:$12 sps:$4 sm:$0xff]   ;;  %v1619_v43 = vld [vmem:[%s2257_s1 + $0x150] ss:$12 sps:$4 sm:$0xff]   ;;  %v1620_v44 = vld [vmem:[%s2257_s1 + $0x68] ss:$12 sps:$4 sm:$0xff]  }
   0xf   :  { %525 = vmatpush1.bf16.msra.mxu0 %v1587_v16  ;;  %v1616_v41 = vld [vmem:[%s2257_s1 + $0x154] ss:$12 sps:$4 sm:$0xff]   ;;  %v1621_v45 = vld [vmem:[%s2257_s1 + $0x13c] ss:$12 sps:$4 sm:$0xff]   ;;  %v1624_v47 = vld [vmem:[%s2257_s1 + $0x138] ss:$12 sps:$4 sm:$0xff]  }
  0x10   :  { %572 = vmatpush1.bf16.msra.mxu1 %v1588_v17  ;;  %526 = vmatprep.subr.bf16.mxu0 %v1589_v18  ;;  %v1623_v46 = vld [vmem:[%s2257_s1 + $0x110] ss:$12 sps:$4 sm:$0xff]   ;;  %v1628_v50 = vld [vmem:[%s2257_s1 + $0xf8] ss:$12 sps:$4 sm:$0xff]   ;;  %v42_v51 = vld [vmem:[%s2258_s0 + $0x8] sm:$0xff]  ;;  %v1728_v8 = vmov 0.0  }
  0x11   :  { %573 = vmatprep.subr.bf16.mxu1 %v1591_v19  ;;  %v1625_v48 = vld [vmem:[%s2257_s1 + $0x50] ss:$12 sps:$4 sm:$0xff]   ;;  %v45_v52 = vld [vmem:[%s2258_s0 + $0x20] sm:$0xff]  ;;  %v1631_v56 = vld [vmem:[%s2257_s1 + $0x10c] ss:$12 sps:$4 sm:$0xff]   ;;  %vm928_vm4 = vcmask 1041408  }
  0x12   :  { %v1626_v49 = vld [vmem:[%s2257_s1 + $0x124] ss:$12 sps:$4 sm:$0xff]   ;;  %v1629_v53 = vld [vmem:[%s2257_s1 + $0x120] ss:$12 sps:$4 sm:$0xff]   ;;  %v48_v54 = vpack.c.bf16 %v45_v52, %v42_v51  ;;  %v1634_v58 = vld [vmem:[%s2257_s1 + $0x108] ss:$12 sps:$4 sm:$0xff]  }
  0x13   :  { %527 = vmatpush1.bf16.msra.mxu0 %v1593_v20  ;;  %v1630_v55 = vld [vmem:[%s2257_s1 + $0x38] ss:$12 sps:$4 sm:$0xff]   ;;  %v1633_v57 = vld [vmem:[%s2257_s1 + $0xe0] ss:$12 sps:$4 sm:$0xff]   ;;  %v1638_v61 = vld [vmem:[%s2257_s1 + $0xc8] ss:$12 sps:$4 sm:$0xff]  }
  0x14   :  { %574 = vmatpush1.bf16.msra.mxu1 %v1594_v21  ;;  %528 = vmatprep.subr.bf16.mxu0 %v1595_v22  ;;  %v1635_v59 = vld [vmem:[%s2257_s1 + $0x20] ss:$12 sps:$4 sm:$0xff]   ;;  %v1639_v62 = vld [vmem:[%s2257_s1 + $0xf0] ss:$12 sps:$4 sm:$0xff]   ;;  %v1640_v63 = vld [vmem:[%s2257_s1 + $0x8] ss:$12 sps:$4 sm:$0xff]  }
  0x15   :  { %575 = vmatprep.subr.bf16.mxu1 %v1597_v23  ;;  %550 = vmatprep.mubr.bf16.mxu0 %v48_v54  ;;  %v1636_v60 = vld [vmem:[%s2257_s1 + $0xf4] ss:$12 sps:$4 sm:$0xff]   ;;  %v1641_v0 = vld [vmem:[%s2257_s1 + $0xdc] ss:$12 sps:$4 sm:$0xff]   ;;  %v1643_v5 = vld [vmem:[%s2257_s1 + $0xd8] ss:$12 sps:$4 sm:$0xff]  }
  0x16   :  { %v41_v2 = vld [vmem:[%s2258_s0] sm:$0xff]  ;;  %v44_v3 = vld [vmem:[%s2258_s0 + $0x18] sm:$0xff]  ;;  %v1648_v11 = vld [vmem:[%s2257_s1 + $0x1e8] ss:$12 sps:$4 sm:$0xff]   ;;  %vm923_vm5 = vcmask 154624   ;;  %vm1144_vm6 = vcmask 1043456  }
  0x17   :  { %529 = vmatpush1.bf16.msra.mxu0 %v1599_v24  ;;  %v1644_v4 = vld [vmem:[%s2257_s1 + $0x200] ss:$12 sps:$4 sm:$0x7f]   ;;  %v1645_v6 = vld [vmem:[%s2257_s1 + $0xc4] ss:$12 sps:$4 sm:$0xff]   ;;  %v47_v7 = vpack.c.bf16 %v44_v3, %v41_v2  ;;  %vm1268_vm7 = vcmask 1045504  }
  0x18   :  { %576 = vmatpush1.bf16.msra.mxu1 %v1600_v25  ;;  %530 = vmatprep.subr.bf16.mxu0 %v1601_v26  ;;  %v516_v9 = vsel %vm508_vm0, %v1644_v4, 0  ;;  %v1647_v10 = vld [vmem:[%s2257_s1 + $0xc0] ss:$12 sps:$4 sm:$0xff]   ;;  %v1655_v12 = vld [vmem:[%s2259_s3 + $0x74] ss:$8 sps:$4 sm:$0xff]   ;;  %vm1140_vm8 = vcmask 588800  }
  0x19   :  { %1487 = vmatprep.subr.bf16.mxu1 %v1603_v29  ;;  %v1653_v13 = vld [vmem:[%s2259_s3 + $0x70] ss:$8 sps:$4 sm:$0xff]   ;;  %v1658_v15 = vld [vmem:[%s2259_s3 + $0x64] ss:$8 sps:$4 sm:$0xff]   ;;  %v1656_v16 = vld [vmem:[%s2259_s3 + $0x60] ss:$8 sps:$4 sm:$0xff]  }
  0x1a   :  { %v1649_v14 = vld [vmem:[%s2257_s1 + $0x1d0] ss:$12 sps:$4 sm:$0xff]   ;;  %v1650_v17 = vld [vmem:[%s2257_s1 + $0x1b8] ss:$12 sps:$4 sm:$0xff]   ;;  %v1651_v18 = vld [vmem:[%s2257_s1 + $0x1a0] ss:$12 sps:$4 sm:$0xff]  }
  0x1b   :  { %1421 = vmatmul.mubr.msk.bf16.vlgmr.msra.gmra.mxu1 %vm504_vm1, %v1878_v30  ;;  %531 = vmatpush1.bf16.msra.mxu0 %v1604_v31  ;;  %v1652_v19 = vld [vmem:[%s2257_s1 + $0x188] ss:$12 sps:$4 sm:$0xff]   ;;  %v1659_v21 = vld [vmem:[%s2259_s3 + $0x50] ss:$8 sps:$4 sm:$0xff]   ;;  %v1664_v22 = vld [vmem:[%s2259_s3 + $0x44] ss:$8 sps:$4 sm:$0xff]  }
  0x1c   :  { %1488 = vmatpush3.bf16.msra.mxu1 %v1605_v32  ;;  %532 = vmatprep.subr.bf16.mxu0 %v1606_v33  ;;  %v1661_v20 = vld [vmem:[%s2259_s3 + $0x54] ss:$8 sps:$4 sm:$0xff]   ;;  %v1662_v23 = vld [vmem:[%s2259_s3 + $0x40] ss:$8 sps:$4 sm:$0xff]   ;;  %v1665_v25 = vld [vmem:[%s2259_s3 + $0x30] ss:$8 sps:$4 sm:$0xff]  }
  0x1d   :  { %1489 = vmatprep.subr.bf16.mxu1 %v1608_v34  ;;  %636 = vmatprep.mubr.bf16.mxu1 %v48_v54  ;;  %v1667_v24 = vld [vmem:[%s2259_s3 + $0x34] ss:$8 sps:$4 sm:$0xff]   ;;  %v1670_v26 = vld [vmem:[%s2259_s3 + $0x24] ss:$8 sps:$4 sm:$0xff]   ;;  %v1668_v27 = vld [vmem:[%s2259_s3 + $0x20] ss:$8 sps:$4 sm:$0xff]  }
  0x1e   :  { %v1673_v28 = vld [vmem:[%s2259_s3 + $0x14] ss:$8 sps:$4 sm:$0xff]   ;;  %v1671_v29 = vld [vmem:[%s2259_s3 + $0x10] ss:$8 sps:$4 sm:$0xff]   ;;  %v1674_v31 = vld [vmem:[%s2259_s3] ss:$8 sps:$4 sm:$0xff]  }
  0x1f   :  { %533 = vmatpush1.bf16.msra.mxu0 %v1609_v35  ;;  %v1679_v32 = vld [vmem:[%s2259_s3 + $0xf4] ss:$8 sps:$4 sm:$0xff]   ;;  %v1677_v33 = vld [vmem:[%s2259_s3 + $0xf0] ss:$8 sps:$4 sm:$0xff]   ;;  %v1682_v34 = vld [vmem:[%s2259_s3 + $0xe4] ss:$8 sps:$4 sm:$0xff]  }
  0x20   :  { %1490 = vmatpush3.bf16.msra.mxu1 %v1610_v36  ;;  %534 = vmatprep.subr.bf16.mxu0 %v1611_v37  ;;  %v1680_v35 = vld [vmem:[%s2259_s3 + $0xe0] ss:$8 sps:$4 sm:$0xff]   ;;  %v1685_v36 = vld [vmem:[%s2259_s3 + $0xd4] ss:$8 sps:$4 sm:$0xff]   ;;  %v1683_v37 = vld [vmem:[%s2259_s3 + $0xd0] ss:$8 sps:$4 sm:$0xff]  }
  0x21   :  { %1491 = vmatprep.subr.bf16.mxu1 %v1613_v38  ;;  %v1688_v38 = vld [vmem:[%s2259_s3 + $0xc4] ss:$8 sps:$4 sm:$0xff]   ;;  %v138_v2 = vld [vmem:[%s2261_s2] sm:$0x7]  ;;  %vm1264_vm9 = vcmask 1022976   ;;  %vm1331_vm10 = vcmask 408576  }
  0x22   :  { %vm1347_vm11 = vcmask 7168  }
  0x23   :  { %535 = vmatpush2.bf16.msra.mxu0 %v1614_v39  ;;  %v1686_v39 = vld [vmem:[%s2259_s3 + $0xc0] ss:$8 sps:$4 sm:$0xff]  }
  0x24   :  { %1492 = vmatpush3.bf16.msra.mxu1 %v1615_v40  ;;  %536 = vmatprep.subr.bf16.mxu0 %v1616_v41  ;;  %v1691_v40 = vld [vmem:[%s2259_s3 + $0xb4] ss:$8 sps:$4 sm:$0xff]   ;;  %v1689_v41 = vld [vmem:[%s2259_s3 + $0xb0] ss:$8 sps:$4 sm:$0xff]  }
  0x25   :  { %1493 = vmatprep.subr.bf16.mxu1 %v1618_v42  ;;  %v1694_v42 = vld [vmem:[%s2259_s3 + $0xa4] ss:$8 sps:$4 sm:$0xff]  }
  0x27   :  { %537 = vmatpush2.bf16.msra.mxu0 %v1619_v43  ;;  %v1692_v43 = vld [vmem:[%s2259_s3 + $0xa0] ss:$8 sps:$4 sm:$0xff]  }
  0x28   :  { %1494 = vmatpush3.bf16.msra.mxu1 %v1620_v44  ;;  %538 = vmatprep.subr.bf16.mxu0 %v1621_v45  ;;  %v1697_v44 = vld [vmem:[%s2259_s3 + $0x94] ss:$8 sps:$4 sm:$0xff]   ;;  %v1695_v45 = vld [vmem:[%s2259_s3 + $0x90] ss:$8 sps:$4 sm:$0xff]  }
  0x29   :  { %1495 = vmatprep.subr.bf16.mxu1 %v1623_v46  ;;  %v1698_v46 = vld [vmem:[%s2259_s3 + $0x80] ss:$8 sps:$4 sm:$0xff]  }
  0x2b   :  { %539 = vmatpush2.bf16.msra.mxu0 %v1624_v47  ;;  %v1700_v47 = vld [vmem:[%s2259_s3 + $0x84] ss:$8 sps:$4 sm:$0xff]  }
  0x2c   :  { %1496 = vmatpush3.bf16.msra.mxu1 %v1625_v48  ;;  %540 = vmatprep.subr.bf16.mxu0 %v1626_v49  ;;  %v735_v48 = vld [vmem:[%s2259_s3 + $0x110] sm:$0x33] }
  0x2d   :  { %1497 = vmatprep.subr.bf16.mxu1 %v1628_v50  ;;  %v1458_v49 = vcombine.high %v735_v48, %v735_v48  ;;  %v1730_v50 = vmov 65535   ;;  %v1457_v52 = vcombine.low %v735_v48, %v735_v48 }
  0x2e   :  { %v929_v51 = vsel %vm927_vm3, 4294967295, %v1730_v50 }
  0x2f   :  { %541 = vmatpush2.bf16.msra.mxu0 %v1629_v53  ;;  %v930_v53 = vsel %vm928_vm4, %v929_v51, 0 }
  0x30   :  { %1498 = vmatpush3.bf16.msra.mxu1 %v1630_v55  ;;  %542 = vmatprep.subr.bf16.mxu0 %v1631_v56  ;;  %v935_v54 = vand.u32 %v1458_v49, %v930_v53  ;;  %v932_v55 = vand.u32 %v1457_v52, %v930_v53  ;;  %v1705_v56 = vld [vmem:[%s2259_s3 + $0x104] ss:$8 sps:$4 sm:$0xff]   ;;  %v1706_v49 = vld [vmem:[%s2260_s5 + $0x38] sm:$0xff]   ;;  %v1707_v52 = vld [vmem:[%s2260_s5 + $0x30] sm:$0xff]  }
  0x31   :  { %1499 = vmatprep.subr.bf16.mxu1 %v1633_v57  ;;  %v1703_v57 = vld [vmem:[%s2259_s3 + $0x100] ss:$8 sps:$4 sm:$0xff]  }
  0x32   :  { %v1708_v53 = vld [vmem:[%s2260_s5 + $0x28] sm:$0xff]  }
  0x33   :  { %543 = vmatpush2.bf16.msra.mxu0 %v1634_v58 }
  0x34   :  { %1500 = vmatpush3.bf16.msra.mxu1 %v1635_v59  ;;  %544 = vmatprep.subr.bf16.mxu0 %v1636_v60  ;;  %v140_v59 = vlaneseq }
  0x35   :  { %1501 = vmatprep.subr.bf16.mxu1 %v1638_v61 }
  0x36   :  { %v2134_v61 = vshrl.u32 %v140_v59, 7  ;;  %v1714_v59 = vld [vmem:[%s2260_s5 + $0x60] ss:$0 sps:$4 sm:$0xff]  }
  0x37   :  { %545 = vmatpush2.bf16.msra.mxu0 %v1639_v62 }
  0x38   :  { %1502 = vmatpush3.bf16.msra.mxu1 %v1640_v63  ;;  %546 = vmatprep.subr.bf16.mxu0 %v1641_v0  ;;  %v142_v62 = vsub.s32 0, %v2134_v61  ;;  %v146_v0 = vsub.s32 1, %v2134_v61 }
  0x39   :  { %1525 = vmatprep.subr.bf16.mxu1 %v1728_v8 }
  0x3a   :  { %v143_v3 = vrot.slane %v138_v2, %v142_v62 }
  0x3b   :  { %637 = vmatmul.mubr.bf16.vlgmr.msra.gmra.mxu1 %v47_v7  ;;  %547 = vmatpush2.bf16.msra.mxu0 %v1643_v5  ;;  %v147_v5 = vrot.slane %v138_v2, %v146_v0 }
  0x3c   :  { %1526 = vmatpush3.bf16.msra.mxu1 %v516_v9  ;;  %548 = vmatprep.subr.bf16.mxu0 %v1645_v6 }
  0x3d   :  { %1527 = vmatprep.subr.bf16.mxu1 %v1728_v8  ;;  %1537 = vmatprep.mubr.msk.bf16.mxu1 %vm1729_vm2, %v1728_v8 }
  0x3f   :  { %549 = vmatpush2.bf16.msra.mxu0 %v1647_v10 }
  0x40   :  { %1528 = vmatpush3.bf16.msra.mxu1 %v1648_v11  ;;  %937 = vmatprep.subr.bf16.mxu0 %v1655_v12 }
  0x41   :  { %1529 = vmatprep.subr.bf16.mxu1 %v1728_v8 }
  0x42   :  { %551 = vmatmul.mubr.bf16.vlgmr.msra.gmra.mxu0 %v47_v7 }
  0x43   :  { %938 = vmatpush1.bf16.msra.mxu0 %v1653_v13 }
  0x44   :  { %1530 = vmatpush3.bf16.msra.mxu1 %v1649_v14  ;;  %939 = vmatprep.subr.bf16.mxu0 %v1658_v15 }
  0x45   :  { %1531 = vmatprep.subr.bf16.mxu1 %v1728_v8 }
  0x47   :  { %940 = vmatpush1.bf16.msra.mxu0 %v1656_v16 }
  0x48   :  { %1532 = vmatpush3.bf16.msra.mxu1 %v1650_v17  ;;  %941 = vmatprep.subr.bf16.mxu0 %v1661_v20  ;;  %v150_v20 = vsub.s32 2, %v2134_v61 }
  0x49   :  { %1533 = vmatprep.subr.bf16.mxu1 %v1728_v8 }
  0x4b   :  { %942 = vmatpush1.bf16.msra.mxu0 %v1659_v21 }
  0x4c   :  { %1534 = vmatpush3.bf16.msra.mxu1 %v1651_v18  ;;  %943 = vmatprep.subr.bf16.mxu0 %v1664_v22 }
  0x4d   :  { %1535 = vmatprep.subr.bf16.mxu1 %v1728_v8 }
  0x4f   :  { %944 = vmatpush1.bf16.msra.mxu0 %v1662_v23 }
  0x50   :  { %1536 = vmatpush3.bf16.msra.mxu1 %v1652_v19  ;;  %945 = vmatprep.subr.bf16.mxu0 %v1667_v24 }
  0x51   :  { %992 = vmatprep.subr.bf16.mxu1 %v935_v54  ;;  %v1709_v54 = vld [vmem:[%s2260_s5 + $0x20] sm:$0xff]  }
  0x53   :  { %1538 = vmatmul.mubr.msk.bf16.vlgmr.msra.gmra.mxu1 %vm504_vm1, %v1878_v30  ;;  %946 = vmatpush1.bf16.msra.mxu0 %v1665_v25  ;;  %v1676_v30 = vld [vmem:[%s2259_s3 + $0x4] ss:$8 sps:$4 sm:$0xff]  }
  0x54   :  { %1012 = vmatprep.mubr.bf16.mxu1 %v1727_v1  ;;  %947 = vmatprep.subr.bf16.mxu0 %v1670_v26 }
  0x55   :  { %993 = vmatpush1.bf16.msra.mxu1 %v932_v55  ;;  %v1710_v55 = vld [vmem:[%s2260_s5 + $0x18] sm:$0xff]  }
  0x56   :  { %994 = vmatprep.subr.bf16.mxu1 %v1705_v56  ;;  %v1711_v56 = vld [vmem:[%s2260_s5 + $0x10] sm:$0xff]  }
  0x57   :  { %948 = vmatpush1.bf16.msra.mxu0 %v1668_v27 }
  0x58   :  { %949 = vmatprep.subr.bf16.mxu0 %v1673_v28 }
  0x59   :  { %995 = vmatpush1.bf16.msra.mxu1 %v1703_v57  ;;  %v1712_v57 = vld [vmem:[%s2260_s5 + $0x8] sm:$0xff]  }
  0x5a   :  { %1148 = vmatprep.subr.bf16.mxu1 %v1727_v1 }
  0x5b   :  { %950 = vmatpush1.bf16.msra.mxu0 %v1671_v29  ;;  %v151_v29 = vrot.slane %v138_v2, %v150_v20  ;;  %v1716_v2 = vld [vmem:[%s2260_s5 + $0x50] sm:$0xff]  }
  0x5c   :  { %951 = vmatprep.subr.bf16.mxu0 %v1676_v30 }
  0x5f   :  { %952 = vmatpush1.bf16.msra.mxu0 %v1674_v31 }
  0x60   :  { %953 = vmatprep.subr.bf16.mxu0 %v1679_v32 }
  0x63   :  { %954 = vmatpush2.bf16.msra.mxu0 %v1677_v33 }
  0x64   :  { %955 = vmatprep.subr.bf16.mxu0 %v1682_v34 }
  0x67   :  { %956 = vmatpush2.bf16.msra.mxu0 %v1680_v35 }
  0x68   :  { %957 = vmatprep.subr.bf16.mxu0 %v1685_v36 }
  0x6b   :  { %958 = vmatpush2.bf16.msra.mxu0 %v1683_v37 }
  0x6c   :  { %959 = vmatprep.subr.bf16.mxu0 %v1688_v38 }
  0x6f   :  { %960 = vmatpush2.bf16.msra.mxu0 %v1686_v39 }
  0x70   :  { %961 = vmatprep.subr.bf16.mxu0 %v1691_v40 }
  0x73   :  { %962 = vmatpush2.bf16.msra.mxu0 %v1689_v41 }
  0x74   :  { %963 = vmatprep.subr.bf16.mxu0 %v1694_v42 }
  0x77   :  { %964 = vmatpush2.bf16.msra.mxu0 %v1692_v43 }
  0x78   :  { %965 = vmatprep.subr.bf16.mxu0 %v1697_v44 }
  0x7b   :  { %966 = vmatpush2.bf16.msra.mxu0 %v1695_v45 }
  0x7c   :  { %967 = vmatprep.subr.bf16.mxu0 %v1700_v47 }
  0x7f   :  { %968 = vmatpush2.bf16.msra.mxu0 %v1698_v46 }
  0x80   :  { %1541 = vmatprep.subr.bf16.mxu0 %v1728_v8 }
  0xdb   :  { %v595_v58 = vpop.f32.mrf.mxu1 }
  0xdd   :  { %v597_v60 = vpop.f32.mrf.mxu1 }
  0xdf   :  { %v599_v63 = vpop.f32.mrf.mxu1 }
  0xe1   :  { %v601_v4 = vpop.f32.mrf.mxu1 }
  0xfb   :  { %v1503_v7 = vpop.f32.mrf.mxu1 }
  0xfd   :  { %v1504_v13 = vpop.f32.mrf.mxu1 }
  0xfe   :  { %v1505_v27 = vadd.f32 %v1504_v13, %v1503_v7  ;;  %v1719_v7 = vld [vmem:[%s2262_s7 + $0x38] sm:$0x7f]  }
  0xff   :  { %v1506_v21 = vpop.f32.mrf.mxu1 }
 0x100   :  { %v639_v37 = vadd.f32 %v1505_v27, %v151_v29 }
 0x101   :  { %v1507_v30 = vpop.f32.mrf.mxu1 }
 0x102   :  { %v552_v6 = vpop.f32.mrf.mxu0  ;;  %v1508_v35 = vadd.f32 %v1507_v30, %v1506_v21 }
 0x103   :  { %v553_v9 = vadd.f32 %v552_v6, %v143_v3 }
 0x104   :  { %v554_v10 = vpop.f32.mrf.mxu0  ;;  %v642_v41 = vadd.f32 %v1508_v35, %v151_v29 }
 0x105   :  { %v555_v11 = vadd.f32 %v554_v10, %v147_v5  ;;  %v596_v16 = vadd.f32 %v595_v58, %v553_v9  ;;  %v1713_v58 = vld [vmem:[%s2260_s5] sm:$0xff]   ;;  %v1720_v10 = vld [vmem:[%s2262_s7 + $0x30] sm:$0xff]  }
 0x106   :  { %v556_v12 = vpop.f32.mrf.mxu0 }
 0x107   :  { %v598_v14 = vadd.f32 %v597_v60, %v555_v11  ;;  %v557_v15 = vadd.f32 %v556_v12, %v143_v3  ;;  %v686_v25 = vmul.f32 0.01, %v596_v16  ;;  %v1146_v60 = vsel %vm1144_vm6, %v1714_v59, 0  ;;  %v1717_v3 = vld [vmem:[%s2260_s5 + $0x48] sm:$0xff]   ;;  %v1723_v11 = vld [vmem:[%s2262_s7 + $0x18] sm:$0xff]  }
 0x108   :  { %v558_v17 = vpop.f32.mrf.mxu0 }
 0x109   :  { %v600_v18 = vadd.f32 %v599_v63, %v557_v15  ;;  %v559_v19 = vadd.f32 %v558_v17, %v147_v5  ;;  %v687_v22 = vmul.f32 0.01, %v598_v14  ;;  %v692_v33 = vmax.f32 %v596_v16, %v686_v25  ;;  %v1715_v63 = vld [vmem:[%s2260_s5 + $0x58] sm:$0xff]  }
 0x10a   :  { %v1269_v5 = vsel %vm1268_vm7, 4294967295, %v1730_v50  ;;  %v1722_v50 = vld [vmem:[%s2262_s7 + $0x20] sm:$0xff]  }
 0x10b   :  { %v689_v23 = vmul.f32 0.01, %v600_v18  ;;  %v602_v24 = vadd.f32 %v601_v4, %v559_v19  ;;  %v693_v31 = vmax.f32 %v598_v14, %v687_v22  ;;  %v1718_v4 = vld [vmem:[%s2260_s5 + $0x40] sm:$0xff]   ;;  %v1270_v6 = vsel %vm508_vm0, %v1269_v5, 0 }
 0x10c   :  { %v1272_v9 = vand.u32 %v1719_v7, %v1270_v6  ;;  %v736_v14 = vld [vmem:[%s2263_s4] sm:$0x3] }
 0x10d   :  { %v690_v26 = vmul.f32 0.01, %v602_v24  ;;  %v695_v28 = vmax.f32 %v600_v18, %v689_v23  ;;  %v745_v15 = vrot.slane %v736_v14, %v146_v0  ;;  %v741_v16 = vrot.slane %v736_v14, %v142_v62  ;;  %v1485_v6 = vld [vmem:[%s2267_s9] ss:$0 sm:$0xff] }
 0x10f   :  { %v696_v32 = vmax.f32 %v602_v24, %v690_v26  ;;  %v698_v36 = vpack.c.bf16 %v695_v28, %v692_v33 }
 0x111   :  { %v699_v34 = vpack.c.bf16 %v696_v32, %v693_v31 }
 0x113   :  { %v679_v38 = vpop.f32.mrf.mxu1  ;;  %969 = vmatprep.mubr.bf16.mxu0 %v699_v34 }
 0x114   :  { %v680_v39 = vadd.f32 %v679_v38, %v639_v37  ;;  %970 = vmatmul.mubr.bf16.vlgmr.msra.gmra.mxu0 %v698_v36  ;;  %v1724_v38 = vld [vmem:[%s2262_s7 + $0x10] sm:$0xff]  }
 0x115   :  { %v1539_v40 = vpop.f32.mrf.mxu1  ;;  %1557 = vmatprep.mubr.msk.bf16.mxu0 %vm1729_vm2, %v1728_v8  ;;  %1542 = vmatpush3.bf16.msra.mxu0 %v1272_v9 }
 0x116   :  { %v688_v43 = vmul.f32 0.01, %v680_v39  ;;  %1543 = vmatprep.subr.bf16.mxu0 %v1728_v8  ;;  %v1726_v40 = vld [vmem:[%s2262_s7] sm:$0xff]  }
 0x117   :  { %v682_v42 = vpop.f32.mrf.mxu1 }
 0x118   :  { %v683_v44 = vadd.f32 %v682_v42, %v642_v41  ;;  %v694_v47 = vmax.f32 %v680_v39, %v688_v43  ;;  %v1725_v39 = vld [vmem:[%s2262_s7 + $0x8] sm:$0xff]   ;;  %v1460_v41 = vld [vmem:[%s2264_s6] ss:$0 sm:$0xff] }
 0x119   :  { %v1540_v45 = vpop.f32.mrf.mxu1  ;;  %1544 = vmatpush3.bf16.msra.mxu0 %v1720_v10 }
 0x11a   :  { %v691_v46 = vmul.f32 0.01, %v683_v44  ;;  %1545 = vmatprep.subr.bf16.mxu0 %v1728_v8 }
 0x11c   :  { %v697_v48 = vmax.f32 %v683_v44, %v691_v46 }
 0x11e   :  { %v700_v51 = vpack.c.bf16 %v697_v48, %v694_v47 }
 0x120   :  { %1459 = vmatmul.mubr.msk.bf16.vlgmr.msra.gmra.mxu1 %vm923_vm5, %v700_v51 }
 0x121   :  { %1149 = vmatpush1.bf16.msra.mxu1 %v1706_v49 }
 0x122   :  { %1150 = vmatprep.subr.bf16.mxu1 %v1727_v1 }
 0x125   :  { %1151 = vmatpush1.bf16.msra.mxu1 %v1707_v52 }
 0x126   :  { %1152 = vmatprep.subr.bf16.mxu1 %v1727_v1 }
 0x129   :  { %1153 = vmatpush1.bf16.msra.mxu1 %v1708_v53  ;;  %v16_v53 = vstv %s2265_s10 }
 0x12a   :  { %1154 = vmatprep.subr.bf16.mxu1 %v1727_v1  ;;  %17 = vst [vmem:[#allocation2] sm:$0x1] %v16_v53 }
 0x12d   :  { %1155 = vmatpush1.bf16.msra.mxu1 %v1709_v54  ;;  %v1475_v54 = vld [vmem:[%s2266_s8] ss:$0 sm:$0xff] }
 0x12e   :  { %1156 = vmatprep.subr.bf16.mxu1 %v1727_v1 }
 0x131   :  { %1157 = vmatpush1.bf16.msra.mxu1 %v1710_v55 }
 0x132   :  { %1158 = vmatprep.subr.bf16.mxu1 %v1727_v1 }
 0x135   :  { %1159 = vmatpush1.bf16.msra.mxu1 %v1711_v56 }
 0x136   :  { %1160 = vmatprep.subr.bf16.mxu1 %v1727_v1 }
 0x139   :  { %1161 = vmatpush1.bf16.msra.mxu1 %v1712_v57 }
 0x13a   :  { %1162 = vmatprep.subr.bf16.mxu1 %v1727_v1 }
 0x13d   :  { %1163 = vmatpush1.bf16.msra.mxu1 %v1713_v58 }
 0x13e   :  { %1170 = vmatprep.subr.bf16.mxu1 %v1727_v1 }
 0x141   :  { %1171 = vmatpush2.bf16.msra.mxu1 %v1146_v60 }
 0x142   :  { %1172 = vmatprep.subr.bf16.mxu1 %v1727_v1 }
 0x145   :  { %1173 = vmatpush2.bf16.msra.mxu1 %v1715_v63 }
 0x146   :  { %1174 = vmatprep.subr.bf16.mxu1 %v1727_v1 }
 0x149   :  { %1175 = vmatpush2.bf16.msra.mxu1 %v1716_v2 }
 0x14a   :  { %1176 = vmatprep.subr.bf16.mxu1 %v1727_v1 }
 0x14d   :  { %1177 = vmatpush2.bf16.msra.mxu1 %v1717_v3 }
 0x14e   :  { %1178 = vmatprep.subr.bf16.mxu1 %v1727_v1  ;;  %v1721_v1 = vld [vmem:[%s2262_s7 + $0x28] sm:$0xff]  }
 0x14f   :  { %1546 = vmatpush3.bf16.msra.mxu0 %v1721_v1 }
 0x150   :  { %1547 = vmatprep.subr.bf16.mxu0 %v1728_v8 }
 0x151   :  { %1179 = vmatpush2.bf16.msra.mxu1 %v1718_v4 }
 0x153   :  { %1548 = vmatpush3.bf16.msra.mxu0 %v1722_v50 }
 0x154   :  { %1549 = vmatprep.subr.bf16.mxu0 %v1728_v8 }
 0x157   :  { %1550 = vmatpush3.bf16.msra.mxu0 %v1723_v11 }
 0x158   :  { %1551 = vmatprep.subr.bf16.mxu0 %v1728_v8 }
 0x15b   :  { %1552 = vmatpush3.bf16.msra.mxu0 %v1724_v38 }
 0x15c   :  { %1553 = vmatprep.subr.bf16.mxu0 %v1728_v8 }
 0x15f   :  { %1554 = vmatpush3.bf16.msra.mxu0 %v1725_v39 }
 0x160   :  { %1555 = vmatprep.subr.bf16.mxu0 %v1728_v8 }
 0x163   :  { %1556 = vmatpush3.bf16.msra.mxu0 %v1726_v40 }
 0x1d4   :  { %v971_v12 = vpop.f32.mrf.mxu0 }
 0x1d5   :  { %v972_v20 = vadd.f32 %v971_v12, %v741_v16  ;;  %v1486_v12 = vld [vmem:[#allocation2] ss:$0 sm:$0xff] }
 0x1d6   :  { %v973_v13 = vpop.f32.mrf.mxu0 }
 0x1d7   :  { %v974_v19 = vadd.f32 %v973_v13, %v745_v15 }
 0x1d8   :  { %v975_v17 = vpop.f32.mrf.mxu0 }
 0x1d9   :  { %v976_v23 = vadd.f32 %v975_v17, %v741_v16 }
 0x1da   :  { %v977_v21 = vpop.f32.mrf.mxu0 }
 0x1db   :  { %v978_v27 = vadd.f32 %v977_v21, %v745_v15 }
 0x1e0   :  { %v1014_v18 = vpop.f32.mrf.mxu1 }
 0x1e1   :  { %v1015_v25 = vadd.f32 %v1014_v18, %v972_v20 }
 0x1e2   :  { %v1016_v22 = vpop.f32.mrf.mxu1 }
 0x1e3   :  { %v1017_v24 = vadd.f32 %v1016_v22, %v974_v19  ;;  %v1023_v0 = vmul.f32 0.01, %v1015_v25 }
 0x1e4   :  { %v1018_v26 = vpop.f32.mrf.mxu1 }
 0x1e5   :  { %v1019_v28 = vadd.f32 %v1018_v26, %v976_v23  ;;  %v1024_v30 = vmul.f32 0.01, %v1017_v24  ;;  %v1027_v35 = vmax.f32 %v1015_v25, %v1023_v0 }
 0x1e6   :  { %v1020_v29 = vpop.f32.mrf.mxu1 }
 0x1e7   :  { %v1025_v31 = vmul.f32 0.01, %v1019_v28  ;;  %v1021_v32 = vadd.f32 %v1020_v29, %v978_v27  ;;  %v1028_v62 = vmax.f32 %v1017_v24, %v1024_v30 }
 0x1e9   :  { %v1026_v33 = vmul.f32 0.01, %v1021_v32  ;;  %v1029_v61 = vmax.f32 %v1019_v28, %v1025_v31 }
 0x1eb   :  { %v1030_v34 = vmax.f32 %v1021_v32, %v1026_v33  ;;  %v1031_v37 = vpack.c.bf16 %v1029_v61, %v1027_v35 }
 0x1ed   :  { %v1032_v36 = vpack.c.bf16 %v1030_v34, %v1028_v62 }
 0x1ef   :  { %1474 = vmatprep.mubr.msk.bf16.mxu1 %vm1140_vm8, %v1032_v36 }
 0x1f0   :  { %1181 = vmatmul.mubr.bf16.vlgmr.msra.gmra.mxu1 %v1031_v37 }
 0x2b0   :  { %v1182_v42 = vpop.f32.mrf.mxu1 }
 0x2b1   :  { %v1183_v43 = vadd.f32 %v1460_v41, %v1182_v42 }
 0x2b2   :  { %v1184_v44 = vpop.f32.mrf.mxu1 }
 0x2b3   :  { %v1189_v46 = vmul.f32 0.01, %v1183_v43 }
 0x2b4   :  { %v1185_v45 = vpop.f32.mrf.mxu1 }
 0x2b5   :  { %v1186_v47 = vadd.f32 %v1460_v41, %v1185_v45  ;;  %v1191_v51 = vmax.f32 %v1183_v43, %v1189_v46 }
 0x2b6   :  { %v1187_v48 = vpop.f32.mrf.mxu1 }
 0x2b7   :  { %v1190_v49 = vmul.f32 0.01, %v1186_v47 }
 0x2b9   :  { %v1192_v52 = vmax.f32 %v1186_v47, %v1190_v49 }
 0x2bb   :  { %v1193_v8 = vpack.c.bf16 %v1192_v52, %v1191_v51 }
 0x2bd   :  { %1558 = vmatmul.mubr.msk.bf16.vlgmr.msra.gmra.mxu0 %vm1264_vm9, %v1193_v8 }
 0x37d   :  { %v1308_v55 = vpop.f32.mrf.mxu0 }
 0x37e   :  { %v1309_v56 = vadd.f32 %v1475_v54, %v1308_v55 }
 0x37f   :  { %v1559_v57 = vpop.f32.mrf.mxu0 }
 0x380   :  { %v1315_v59 = vmul.f32 0.01, %v1309_v56 }
 0x381   :  { %v1311_v58 = vpop.f32.mrf.mxu0 }
 0x382   :  { %v1312_v60 = vadd.f32 %v1475_v54, %v1311_v58  ;;  %v1317_v3 = vmax.f32 %v1309_v56, %v1315_v59 }
 0x383   :  { %v1560_v63 = vpop.f32.mrf.mxu0 }
 0x384   :  { %v1316_v2 = vmul.f32 0.01, %v1312_v60 }
 0x386   :  { %v1318_v4 = vmax.f32 %v1312_v60, %v1316_v2 }
 0x388   :  { %v1319_v5 = vpack.c.bf16 %v1318_v4, %v1317_v3 }
 0x38a   :  { %v1320_v7 = vunpack.c.l.bf16 %v1319_v5  ;;  %v1321_v9 = vunpack.c.h.bf16 %v1319_v5 }
 0x38c   :  { %v1329_v10 = vmul.f32 %v1485_v6, %v1320_v7  ;;  %v1330_v50 = vmul.f32 %v1485_v6, %v1321_v9 }
 0x38e   :  { %v1332_v1 = vsel %vm1331_vm10, %v1329_v10, 0.0  ;;  %v1335_v11 = vsel %vm1331_vm10, %v1330_v50, 0.0 }
 0x38f   :  { %1333 = vadd.xlane.f32.xlu0 %v1332_v1 }
 0x393   :  { %1336 = vadd.xlane.f32.xlu0 %v1335_v11 }
 0x418   :  { %v1334_v13 = vpop.xlane.xlu0 %1333 }
 0x419   :  { %v1345_v14 = vadd.f32 %v1486_v12, %v1334_v13 }
 0x41b   :  { %1348 = vst.msk [vmem:[%s2268_s11] sm:$0xff] %vm1347_vm11, %v1345_v14 }
 0x41c   :  { %v1337_v15 = vpop.xlane.xlu0 %1336 }
 0x41d   :  { %v1346_v16 = vadd.f32 %v1486_v12, %v1337_v15 }
 0x41f   :  { %1349 = vst.msk [vmem:[%s2268_s11 + $0x8] sm:$0xff] %vm1347_vm11, %v1346_v16 }

</bundles_post_ra>
